<compile_context>
chip_gen: v7x
topology: tpu7x:2x2x1
jax: 0.10.0
libtpu: 0.0.40
codegen_flags: <defaults>
</compile_context>

<pallas_src>
import math

import jax
import jax.numpy as jnp
from jax.experimental import pallas as pl
from jax.experimental.pallas import tpu as pltpu


# ----------------------------- helpers ---------------------------------------


def _round_up(x, m):
    return ((x + m - 1) // m) * m


def _vmem_capacity_bytes():
    try:
        return int(pltpu.get_tpu_info().vmem_capacity_bytes)
    except Exception:
        return 64 * 1024 * 1024  # v7x floor; conservative on every generation


def _vmem_estimate_bytes(row_tile, d_pad, b_pad, io_bytes, w_bytes, *, invariant_bufs=1):
    # x and out tiles are double-buffered by the BlockSpec pipeline.
    io = 2 * row_tile * d_pad * io_bytes * 2
    # Loop-invariant operands (weights / biases / LN params).
    weights = invariant_bufs * (2 * d_pad * b_pad * w_bytes + (b_pad + 3 * d_pad) * 4)
    # f32 intermediates actually live in the body: h (b_pad), y and centered (d_pad each),
    # plus headroom for the bf16 casts feeding the MXU.
    scratch = row_tile * (3 * d_pad + b_pad) * 4
    return io + weights + scratch


def _pick_row_tile(rows, d_pad, b_pad, io_bytes, w_bytes, *, budget_frac=0.45):
    budget = int(_vmem_capacity_bytes() * budget_frac)
    tile = 8
    # Sweep capped at 512: mem-bound kernels saturate HBM at 512-row tiles on all generations;
    # larger tiles only add VMEM pressure and pipeline fill/drain.
    for cand in (512, 256, 128, 64, 32, 16, 8):
        if _vmem_estimate_bytes(cand, d_pad, b_pad, io_bytes, w_bytes, invariant_bufs=2) <= budget:
            tile = cand
            break
    # Never pad a tiny input up to a huge tile.
    tile = min(tile, _round_up(rows, 8))
    # Guarantee >= 2 grid steps so both TensorCores get work on v7x megacore
    # (negligible overhead on single-TC v5e/v6e: one extra ~0.35us pipeline step).
    if rows > 8:
        tile = min(tile, _round_up(-(-rows // 2), 8))
    return max(tile, 8)


# ----------------------------- kernel -----------------------------------------


def _make_adapter_kernel(d_true, d_pad, compute_dtype):
    pad_lanes = d_pad - d_true
    inv_d = 1.0 / float(d_true)
    inv_sqrt2 = 1.0 / math.sqrt(2.0)

    def kernel(x_ref, wd_ref, bd_ref, wu_ref, bu_ref, gamma_ref, beta_ref, o_ref):
        # down projection on the MXU: bf16 operands, f32 accumulation
        h = jnp.dot(x_ref[...].astype(compute_dtype), wd_ref[...],
                    preferred_element_type=jnp.float32)
        h = h + bd_ref[...]
        # exact (erf) GELU in f32, matches torch nn.GELU() default
        h = 0.5 * h * (1.0 + jax.lax.erf(h * inv_sqrt2))

        # up projection on the MXU
        y = jnp.dot(h.astype(compute_dtype), wu_ref[...],
                    preferred_element_type=jnp.float32)
        y = y + bu_ref[...]

        # dropout is identity in eval/inference mode; residual re-read from VMEM here so no
        # f32 copy of x stays live across both matmuls.
        y = y + x_ref[...].astype(jnp.float32)

        # LayerNorm over the *true* d_model.  Padded lanes of y are exactly zero, so there
        # centered == -mean; subtract that contribution analytically instead of masking.
        mean = jnp.sum(y, axis=-1, keepdims=True) * inv_d
        centered = y - mean
        sumsq = jnp.sum(centered * centered, axis=-1, keepdims=True)
        if pad_lanes:
            sumsq = sumsq - float(pad_lanes) * (mean * mean)
        var = sumsq * inv_d
        y = centered * jax.lax.rsqrt(var + 1e-5)
        y = y * gamma_ref[...] + beta_ref[...]

        o_ref[...] = y.astype(o_ref.dtype)

    return kernel


# ----------------------------- params preparation ------------------------------


def prepare_params(params, *, compute_dtype=jnp.bfloat16):
    """Cast weights to the MXU dtype and pad to lane multiples ONCE (hoist out of per-call path)."""
    d_model, bottleneck = params["w_down"].shape
    d_pad = d_model if d_model % 128 == 0 else _round_up(d_model, 128)
    b_pad = _round_up(bottleneck, 128)

    wd = params["w_down"].astype(compute_dtype)
    wu = params["w_up"].astype(compute_dtype)
    bd = params["b_down"].astype(jnp.float32)
    bu = params["b_up"].astype(jnp.float32)
    gamma = params["ln_gamma"].astype(jnp.float32)
    beta = params["ln_beta"].astype(jnp.float32)

    if d_pad != d_model or b_pad != bottleneck:
        wd = jnp.pad(wd, ((0, d_pad - d_model), (0, b_pad - bottleneck)))
        wu = jnp.pad(wu, ((0, b_pad - bottleneck), (0, d_pad - d_model)))
        bd = jnp.pad(bd, (0, b_pad - bottleneck))
        bu = jnp.pad(bu, (0, d_pad - d_model))
        gamma = jnp.pad(gamma, (0, d_pad - d_model))
        beta = jnp.pad(beta, (0, d_pad - d_model))

    return {
        "_prepared": True,
        "d_model": d_model,
        "bottleneck": bottleneck,
        "d_pad": d_pad,
        "b_pad": b_pad,
        "w_down": wd,
        "w_up": wu,
        "b_down": bd[None, :],
        "b_up": bu[None, :],
        "ln_gamma": gamma[None, :],
        "ln_beta": beta[None, :],
    }


# ----------------------------- wrapper -----------------------------------------


def _in_specs(row_tile, d_pad, b_pad, invariant_pipeline_mode):
    kw = {} if invariant_pipeline_mode is None else {"pipeline_mode": invariant_pipeline_mode}

    def const(shape):
        return pl.BlockSpec(shape, lambda i: (0, 0), **kw)

    return [
        pl.BlockSpec((row_tile, d_pad), lambda i: (i, 0)),  # x tile (pipelined, ragged last block)
        const((d_pad, b_pad)),                              # W_down (loop-invariant)
        const((1, b_pad)),                                  # b_down
        const((b_pad, d_pad)),                              # W_up   (loop-invariant)
        const((1, d_pad)),                                  # b_up
        const((1, d_pad)),                                  # ln gamma
        const((1, d_pad)),                                  # ln beta
    ]


def task_adapter(hidden_states, params, *, row_tile=None,
                 compute_dtype=jnp.bfloat16, out_dtype=None):
    """hidden_states: (B, S, D). params: raw dict (see init_params) or prepare_params() output.

    out_dtype defaults to hidden_states.dtype; pass jnp.bfloat16 if the surrounding model
    tolerates bf16 I/O (halves HBM traffic for this mem-bound kernel).
    """
    B, S, D = hidden_states.shape
    rows = B * S
    in_dtype = hidden_states.dtype
    out_dtype = in_dtype if out_dtype is None else out_dtype

    prep = params if params.get("_prepared", False) else prepare_params(
        params, compute_dtype=compute_dtype)
    assert prep["d_model"] == D, "d_model mismatch between params and hidden_states"
    d_pad, b_pad, bott = prep["d_pad"], prep["b_pad"], prep["bottleneck"]
    compute_dtype = prep["w_down"].dtype

    x2d = hidden_states.reshape(rows, D)
    if d_pad != D:
        # Only taken when d_model % 128 != 0 (one extra HBM pass on x; none for 768/1024/4096...).
        x2d = jnp.pad(x2d, ((0, 0), (0, d_pad - D)))

    io_bytes = max(jnp.dtype(in_dtype).itemsize, jnp.dtype(out_dtype).itemsize)
    w_bytes = jnp.dtype(compute_dtype).itemsize
    if row_tile is None:
        row_tile = _pick_row_tile(rows, d_pad, b_pad, io_bytes, w_bytes)
    row_tile = max(8, min(_round_up(int(row_tile), 8), _round_up(rows, 8)))

    # Ragged last block handled by Pallas: partial reads, masked per-row stores; no row padding.
    grid = (pl.cdiv(rows, row_tile),)

    cap = _vmem_capacity_bytes()
    est = _vmem_estimate_bytes(row_tile, d_pad, b_pad, io_bytes, w_bytes, invariant_bufs=2)
    vmem_limit = int(min(int(cap * 0.9), max(32 * 1024 * 1024, 2 * est)))

    cost = pl.CostEstimate(
        flops=int(4 * rows * D * bott + 10 * rows * D),
        transcendentals=int(rows * bott + rows),
        bytes_accessed=int(
            rows * d_pad * (jnp.dtype(in_dtype).itemsize + jnp.dtype(out_dtype).itemsize)
            + 2 * d_pad * b_pad * w_bytes + (b_pad + 3 * d_pad) * 4),
    )

    kernel = _make_adapter_kernel(D, d_pad, compute_dtype)
    operands = (x2d, prep["w_down"], prep["b_down"], prep["w_up"], prep["b_up"],
                prep["ln_gamma"], prep["ln_beta"])

    out2d = None
    last_err = None
    # Try single-buffered loop-invariant operands first (saves ~half the weight VMEM);
    # fall back to default double-buffering if this jax version rejects Buffered(1).
    for inv_mode in (pl.Buffered(1), None):
        try:
            out2d = pl.pallas_call(
                kernel,
                out_shape=jax.ShapeDtypeStruct((rows, d_pad), out_dtype),
                grid_spec=pltpu.PrefetchScalarGridSpec(
                    num_scalar_prefetch=0,
                    grid=grid,
                    in_specs=_in_specs(row_tile, d_pad, b_pad, inv_mode),
                    out_specs=pl.BlockSpec((row_tile, d_pad), lambda i: (i, 0)),
                ),
                compiler_params=pltpu.CompilerParams(
                    dimension_semantics=("parallel",),  # row axis shards across TCs on v7x
                    vmem_limit_bytes=vmem_limit,
                ),
                cost_estimate=cost,
            )(*operands)
            break
        except Exception as e:  # fall back once, then re-raise
            last_err = e
            out2d = None
    if out2d is None:
        raise last_err

    if d_pad != D:
        out2d = out2d[:, :D]
    return out2d.reshape(B, S, D)


# ----------------------------- init + reference --------------------------------


def init_params(key, d_model, bottleneck):
    """Deterministic init mimicking torch Linear/LayerNorm defaults."""
    k1, k2, k3, k4 = jax.random.split(key, 4)
    lim_d = 1.0 / math.sqrt(d_model)
    lim_b = 1.0 / math.sqrt(bottleneck)
    return {
        "w_down": jax.random.uniform(k1, (d_model, bottleneck), jnp.float32, -lim_d, lim_d),
        "b_down": jax.random.uniform(k2, (bottleneck,), jnp.float32, -lim_d, lim_d),
        "w_up": jax.random.uniform(k3, (bottleneck, d_model), jnp.float32, -lim_b, lim_b),
        "b_up": jax.random.uniform(k4, (d_model,), jnp.float32, -lim_b, lim_b),
        "ln_gamma": jnp.ones((d_model,), jnp.float32),
        "ln_beta": jnp.zeros((d_model,), jnp.float32),
    }


def reference(hidden_states, params, *, compute_dtype=jnp.float32):
    """Pure-JAX reference. compute_dtype controls the matmul operand precision."""
    x = hidden_states.astype(jnp.float32)
    h = jnp.dot(x.astype(compute_dtype), params["w_down"].astype(compute_dtype),
                preferred_element_type=jnp.float32) + params["b_down"]
    h = 0.5 * h * (1.0 + jax.lax.erf(h / math.sqrt(2.0)))
    y = jnp.dot(h.astype(compute_dtype), params["w_up"].astype(compute_dtype),
                preferred_element_type=jnp.float32) + params["b_up"]
    y = y + x
    mean = jnp.mean(y, axis=-1, keepdims=True)
    var = jnp.mean((y - mean) ** 2, axis=-1, keepdims=True)
    y = (y - mean) * jax.lax.rsqrt(var + 1e-5)
    return (y * params["ln_gamma"] + params["ln_beta"]).astype(hidden_states.dtype)


# ----------------------------- demo --------------------------------------------


if __name__ == "__main__":
    key = jax.random.PRNGKey(0)
    k_x, k_p = jax.random.split(key)

    batch, seq, d_model, bottleneck = 2, 8, 32, 64
    hidden_states = jax.random.normal(k_x, (batch, seq, d_model), jnp.float32)
    raw_params = init_params(k_p, d_model, bottleneck)

    # Weights are cast/padded once, outside the per-call path.
    prepared = prepare_params(raw_params)

    out = jax.block_until_ready(task_adapter(hidden_states, prepared))

    ref_matched = reference(hidden_states, raw_params, compute_dtype=jnp.bfloat16)
    ref_f32 = reference(hidden_states, raw_params, compute_dtype=jnp.float32)

    assert out.shape == (batch, seq, d_model)
    assert jnp.allclose(out, ref_matched, atol=2e-3, rtol=2e-3), \
        "mismatch vs precision-matched (bf16-matmul) reference"
    assert jnp.allclose(out, ref_f32, atol=1e-1, rtol=1e-1), \
        "mismatch vs f32 reference"

    print("KERNEL_OK")
</pallas_src>

<mosaic_0001>
module attributes {stable_mosaic.version = 11 : i64} {
  func.func @kernel(%arg0: i32, %arg1: memref<8x128xf32, #tpu.memory_space<vmem>>, %arg2: memref<128x128xbf16, #tpu.memory_space<vmem>>, %arg3: memref<1x128xf32, #tpu.memory_space<vmem>>, %arg4: memref<128x128xbf16, #tpu.memory_space<vmem>>, %arg5: memref<1x128xf32, #tpu.memory_space<vmem>>, %arg6: memref<1x128xf32, #tpu.memory_space<vmem>>, %arg7: memref<1x128xf32, #tpu.memory_space<vmem>>, %arg8: memref<8x128xf32, #tpu.memory_space<vmem>>) attributes {dimension_semantics = [#tpu.dimension_semantics<parallel>], iteration_bounds = array<i64: 2>, scalar_prefetch = 0 : i64, scratch_operands = 0 : i64, tpu.core_type = #tpu.core_type<tc>, window_params = [{transform_indices = @transform_0, window_bounds = array<i64: 8, 128>}, {pipeline_mode = #tpu.pipeline_mode<synchronous>, transform_indices = @transform_1, window_bounds = array<i64: 128, 128>}, {pipeline_mode = #tpu.pipeline_mode<synchronous>, transform_indices = @transform_2, window_bounds = array<i64: 1, 128>}, {pipeline_mode = #tpu.pipeline_mode<synchronous>, transform_indices = @transform_3, window_bounds = array<i64: 128, 128>}, {pipeline_mode = #tpu.pipeline_mode<synchronous>, transform_indices = @transform_4, window_bounds = array<i64: 1, 128>}, {pipeline_mode = #tpu.pipeline_mode<synchronous>, transform_indices = @transform_5, window_bounds = array<i64: 1, 128>}, {pipeline_mode = #tpu.pipeline_mode<synchronous>, transform_indices = @transform_6, window_bounds = array<i64: 1, 128>}, {transform_indices = @transform_7, window_bounds = array<i64: 8, 128>}]} {
    %c0 = arith.constant 0 : index
    %c0_0 = arith.constant 0 : index
    %0 = vector.load %arg1[%c0, %c0_0] : memref<8x128xf32, #tpu.memory_space<vmem>>, vector<8x128xf32>
    %1 = arith.truncf %0 : vector<8x128xf32> to vector<8x128xbf16>
    %c0_1 = arith.constant 0 : index
    %c0_2 = arith.constant 0 : index
    %2 = vector.load %arg2[%c0_1, %c0_2] : memref<128x128xbf16, #tpu.memory_space<vmem>>, vector<128x128xbf16>
    %cst = arith.constant dense<0.000000e+00> : vector<8x128xf32>
    %3 = tpu.matmul %1, %2, %cst {dimension_numbers = #tpu.dot_dimension_numbers<[1], [0], [0], [1], [0, 0, 1, 1], [], []>} : vector<8x128xbf16>, vector<128x128xbf16>, vector<8x128xf32> -> vector<8x128xf32>
    %c0_3 = arith.constant 0 : index
    %c0_4 = arith.constant 0 : index
    %4 = vector.load %arg3[%c0_3, %c0_4] : memref<1x128xf32, #tpu.memory_space<vmem>>, vector<1x128xf32>
    %5 = vector.broadcast %4 : vector<1x128xf32> to vector<8x128xf32>
    %6 = arith.addf %3, %5 : vector<8x128xf32>
    %cst_5 = arith.constant 5.000000e-01 : f32
    %7 = vector.broadcast %cst_5 : f32 to vector<8x128xf32>
    %8 = arith.mulf %7, %6 : vector<8x128xf32>
    %cst_6 = arith.constant 0.707106769 : f32
    %9 = vector.broadcast %cst_6 : f32 to vector<8x128xf32>
    %10 = arith.mulf %6, %9 : vector<8x128xf32>
    %11 = math.erf %10 : vector<8x128xf32>
    %cst_7 = arith.constant 1.000000e+00 : f32
    %12 = vector.broadcast %cst_7 : f32 to vector<8x128xf32>
    %13 = arith.addf %12, %11 : vector<8x128xf32>
    %14 = arith.mulf %8, %13 : vector<8x128xf32>
    %15 = arith.truncf %14 : vector<8x128xf32> to vector<8x128xbf16>
    %c0_8 = arith.constant 0 : index
    %c0_9 = arith.constant 0 : index
    %16 = vector.load %arg4[%c0_8, %c0_9] : memref<128x128xbf16, #tpu.memory_space<vmem>>, vector<128x128xbf16>
    %cst_10 = arith.constant dense<0.000000e+00> : vector<8x128xf32>
    %17 = tpu.matmul %15, %16, %cst_10 {dimension_numbers = #tpu.dot_dimension_numbers<[1], [0], [0], [1], [0, 0, 1, 1], [], []>} : vector<8x128xbf16>, vector<128x128xbf16>, vector<8x128xf32> -> vector<8x128xf32>
    %c0_11 = arith.constant 0 : index
    %c0_12 = arith.constant 0 : index
    %18 = vector.load %arg5[%c0_11, %c0_12] : memref<1x128xf32, #tpu.memory_space<vmem>>, vector<1x128xf32>
    %19 = vector.broadcast %18 : vector<1x128xf32> to vector<8x128xf32>
    %20 = arith.addf %17, %19 : vector<8x128xf32>
    %c0_13 = arith.constant 0 : index
    %c0_14 = arith.constant 0 : index
    %21 = vector.load %arg1[%c0_13, %c0_14] : memref<8x128xf32, #tpu.memory_space<vmem>>, vector<8x128xf32>
    %22 = arith.addf %20, %21 : vector<8x128xf32>
    %cst_15 = arith.constant dense<0.000000e+00> : vector<8xf32>
    %23 = vector.multi_reduction <add>, %22, %cst_15 [1] : vector<8x128xf32> to vector<8xf32>
    %24 = vector.shape_cast %23 : vector<8xf32> to vector<8x1xf32>
    %cst_16 = arith.constant 3.125000e-02 : f32
    %25 = vector.broadcast %cst_16 : f32 to vector<8x1xf32>
    %26 = arith.mulf %24, %25 : vector<8x1xf32>
    %27 = vector.broadcast %26 : vector<8x1xf32> to vector<8x128xf32>
    %28 = arith.subf %22, %27 : vector<8x128xf32>
    %29 = arith.mulf %28, %28 : vector<8x128xf32>
    %cst_17 = arith.constant dense<0.000000e+00> : vector<8xf32>
    %30 = vector.multi_reduction <add>, %29, %cst_17 [1] : vector<8x128xf32> to vector<8xf32>
    %31 = vector.shape_cast %30 : vector<8xf32> to vector<8x1xf32>
    %32 = arith.mulf %26, %26 : vector<8x1xf32>
    %cst_18 = arith.constant 9.600000e+01 : f32
    %33 = vector.broadcast %cst_18 : f32 to vector<8x1xf32>
    %34 = arith.mulf %33, %32 : vector<8x1xf32>
    %35 = arith.subf %31, %34 : vector<8x1xf32>
    %cst_19 = arith.constant 3.125000e-02 : f32
    %36 = vector.broadcast %cst_19 : f32 to vector<8x1xf32>
    %37 = arith.mulf %35, %36 : vector<8x1xf32>
    %cst_20 = arith.constant 9.99999974E-6 : f32
    %38 = vector.broadcast %cst_20 : f32 to vector<8x1xf32>
    %39 = arith.addf %37, %38 : vector<8x1xf32>
    %40 = math.rsqrt %39 : vector<8x1xf32>
    %41 = vector.broadcast %40 : vector<8x1xf32> to vector<8x128xf32>
    %42 = arith.mulf %28, %41 : vector<8x128xf32>
    %c0_21 = arith.constant 0 : index
    %c0_22 = arith.constant 0 : index
    %43 = vector.load %arg6[%c0_21, %c0_22] : memref<1x128xf32, #tpu.memory_space<vmem>>, vector<1x128xf32>
    %44 = vector.broadcast %43 : vector<1x128xf32> to vector<8x128xf32>
    %45 = arith.mulf %42, %44 : vector<8x128xf32>
    %c0_23 = arith.constant 0 : index
    %c0_24 = arith.constant 0 : index
    %46 = vector.load %arg7[%c0_23, %c0_24] : memref<1x128xf32, #tpu.memory_space<vmem>>, vector<1x128xf32>
    %47 = vector.broadcast %46 : vector<1x128xf32> to vector<8x128xf32>
    %48 = arith.addf %45, %47 : vector<8x128xf32>
    %c0_25 = arith.constant 0 : index
    %c0_26 = arith.constant 0 : index
    %49 = vector.load %arg8[%c0_25, %c0_26] : memref<8x128xf32, #tpu.memory_space<vmem>>, vector<8x128xf32>
    tpu.vector_store %arg8[%c0_25, %c0_26], %48 {strides = array<i32>} : memref<8x128xf32, #tpu.memory_space<vmem>>, vector<8x128xf32>,
    return
  }
  func.func @transform_0(%arg0: i32) -> (i32, i32) {
    %c0_i32 = arith.constant 0 : i32
    %c0_i32_0 = arith.constant 0 : i32
    return %arg0, %c0_i32 : i32, i32
  }
  func.func @transform_1(%arg0: i32) -> (i32, i32) {
    %c0_i32 = arith.constant 0 : i32
    %c0_i32_0 = arith.constant 0 : i32
    %c0_i32_1 = arith.constant 0 : i32
    return %c0_i32, %c0_i32_0 : i32, i32
  }
  func.func @transform_2(%arg0: i32) -> (i32, i32) {
    %c0_i32 = arith.constant 0 : i32
    %c0_i32_0 = arith.constant 0 : i32
    %c0_i32_1 = arith.constant 0 : i32
    return %c0_i32, %c0_i32_0 : i32, i32
  }
  func.func @transform_3(%arg0: i32) -> (i32, i32) {
    %c0_i32 = arith.constant 0 : i32
    %c0_i32_0 = arith.constant 0 : i32
    %c0_i32_1 = arith.constant 0 : i32
    return %c0_i32, %c0_i32_0 : i32, i32
  }
  func.func @transform_4(%arg0: i32) -> (i32, i32) {
    %c0_i32 = arith.constant 0 : i32
    %c0_i32_0 = arith.constant 0 : i32
    %c0_i32_1 = arith.constant 0 : i32
    return %c0_i32, %c0_i32_0 : i32, i32
  }
  func.func @transform_5(%arg0: i32) -> (i32, i32) {
    %c0_i32 = arith.constant 0 : i32
    %c0_i32_0 = arith.constant 0 : i32
    %c0_i32_1 = arith.constant 0 : i32
    return %c0_i32, %c0_i32_0 : i32, i32
  }
  func.func @transform_6(%arg0: i32) -> (i32, i32) {
    %c0_i32 = arith.constant 0 : i32
    %c0_i32_0 = arith.constant 0 : i32
    %c0_i32_1 = arith.constant 0 : i32
    return %c0_i32, %c0_i32_0 : i32, i32
  }
  func.func @transform_7(%arg0: i32) -> (i32, i32) {
    %c0_i32 = arith.constant 0 : i32
    %c0_i32_0 = arith.constant 0 : i32
    return %arg0, %c0_i32 : i32, i32
  }
}

module attributes {stable_mosaic.version = 11 : i64} {
  func.func @kernel(%arg0: i32, %arg1: memref<8x128xf32, #tpu.memory_space<vmem>>, %arg2: memref<128x128xbf16, #tpu.memory_space<vmem>>, %arg3: memref<1x128xf32, #tpu.memory_space<vmem>>, %arg4: memref<128x128xbf16, #tpu.memory_space<vmem>>, %arg5: memref<1x128xf32, #tpu.memory_space<vmem>>, %arg6: memref<1x128xf32, #tpu.memory_space<vmem>>, %arg7: memref<1x128xf32, #tpu.memory_space<vmem>>, %arg8: memref<8x128xf32, #tpu.memory_space<vmem>>) attributes {dimension_semantics = [#tpu.dimension_semantics<parallel>], iteration_bounds = array<i64: 2>, scalar_prefetch = 0 : i64, scratch_operands = 0 : i64, tpu.core_type = #tpu.core_type<tc>, window_params = [{transform_indices = @transform_0, window_bounds = array<i64: 8, 128>}, {pipeline_mode = #tpu.pipeline_mode<synchronous>, transform_indices = @transform_1, window_bounds = array<i64: 128, 128>}, {pipeline_mode = #tpu.pipeline_mode<synchronous>, transform_indices = @transform_2, window_bounds = array<i64: 1, 128>}, {pipeline_mode = #tpu.pipeline_mode<synchronous>, transform_indices = @transform_3, window_bounds = array<i64: 128, 128>}, {pipeline_mode = #tpu.pipeline_mode<synchronous>, transform_indices = @transform_4, window_bounds = array<i64: 1, 128>}, {pipeline_mode = #tpu.pipeline_mode<synchronous>, transform_indices = @transform_5, window_bounds = array<i64: 1, 128>}, {pipeline_mode = #tpu.pipeline_mode<synchronous>, transform_indices = @transform_6, window_bounds = array<i64: 1, 128>}, {transform_indices = @transform_7, window_bounds = array<i64: 8, 128>}]} {
    %c0 = arith.constant 0 : index
    %c0_0 = arith.constant 0 : index
    %0 = vector.load %arg1[%c0, %c0_0] : memref<8x128xf32, #tpu.memory_space<vmem>>, vector<8x128xf32>
    %1 = arith.truncf %0 : vector<8x128xf32> to vector<8x128xbf16>
    %c0_1 = arith.constant 0 : index
    %c0_2 = arith.constant 0 : index
    %2 = vector.load %arg2[%c0_1, %c0_2] : memref<128x128xbf16, #tpu.memory_space<vmem>>, vector<128x128xbf16>
    %cst = arith.constant dense<0.000000e+00> : vector<8x128xf32>
    %3 = tpu.matmul %1, %2, %cst {dimension_numbers = #tpu.dot_dimension_numbers<[1], [0], [0], [1], [0, 0, 1, 1], [], []>} : vector<8x128xbf16>, vector<128x128xbf16>, vector<8x128xf32> -> vector<8x128xf32>
    %c0_3 = arith.constant 0 : index
    %c0_4 = arith.constant 0 : index
    %4 = vector.load %arg3[%c0_3, %c0_4] : memref<1x128xf32, #tpu.memory_space<vmem>>, vector<1x128xf32>
    %5 = vector.broadcast %4 : vector<1x128xf32> to vector<8x128xf32>
    %6 = arith.addf %3, %5 : vector<8x128xf32>
    %cst_5 = arith.constant 5.000000e-01 : f32
    %7 = vector.broadcast %cst_5 : f32 to vector<8x128xf32>
    %8 = arith.mulf %7, %6 : vector<8x128xf32>
    %cst_6 = arith.constant 0.707106769 : f32
    %9 = vector.broadcast %cst_6 : f32 to vector<8x128xf32>
    %10 = arith.mulf %6, %9 : vector<8x128xf32>
    %11 = math.erf %10 : vector<8x128xf32>
    %cst_7 = arith.constant 1.000000e+00 : f32
    %12 = vector.broadcast %cst_7 : f32 to vector<8x128xf32>
    %13 = arith.addf %12, %11 : vector<8x128xf32>
    %14 = arith.mulf %8, %13 : vector<8x128xf32>
    %15 = arith.truncf %14 : vector<8x128xf32> to vector<8x128xbf16>
    %c0_8 = arith.constant 0 : index
    %c0_9 = arith.constant 0 : index
    %16 = vector.load %arg4[%c0_8, %c0_9] : memref<128x128xbf16, #tpu.memory_space<vmem>>, vector<128x128xbf16>
    %cst_10 = arith.constant dense<0.000000e+00> : vector<8x128xf32>
    %17 = tpu.matmul %15, %16, %cst_10 {dimension_numbers = #tpu.dot_dimension_numbers<[1], [0], [0], [1], [0, 0, 1, 1], [], []>} : vector<8x128xbf16>, vector<128x128xbf16>, vector<8x128xf32> -> vector<8x128xf32>
    %c0_11 = arith.constant 0 : index
    %c0_12 = arith.constant 0 : index
    %18 = vector.load %arg5[%c0_11, %c0_12] : memref<1x128xf32, #tpu.memory_space<vmem>>, vector<1x128xf32>
    %19 = vector.broadcast %18 : vector<1x128xf32> to vector<8x128xf32>
    %20 = arith.addf %17, %19 : vector<8x128xf32>
    %c0_13 = arith.constant 0 : index
    %c0_14 = arith.constant 0 : index
    %21 = vector.load %arg1[%c0_13, %c0_14] : memref<8x128xf32, #tpu.memory_space<vmem>>, vector<8x128xf32>
    %22 = arith.addf %20, %21 : vector<8x128xf32>
    %cst_15 = arith.constant dense<0.000000e+00> : vector<8xf32>
    %23 = vector.multi_reduction <add>, %22, %cst_15 [1] : vector<8x128xf32> to vector<8xf32>
    %24 = vector.shape_cast %23 : vector<8xf32> to vector<8x1xf32>
    %cst_16 = arith.constant 3.125000e-02 : f32
    %25 = vector.broadcast %cst_16 : f32 to vector<8x1xf32>
    %26 = arith.mulf %24, %25 : vector<8x1xf32>
    %27 = vector.broadcast %26 : vector<8x1xf32> to vector<8x128xf32>
    %28 = arith.subf %22, %27 : vector<8x128xf32>
    %29 = arith.mulf %28, %28 : vector<8x128xf32>
    %cst_17 = arith.constant dense<0.000000e+00> : vector<8xf32>
    %30 = vector.multi_reduction <add>, %29, %cst_17 [1] : vector<8x128xf32> to vector<8xf32>
    %31 = vector.shape_cast %30 : vector<8xf32> to vector<8x1xf32>
    %32 = arith.mulf %26, %26 : vector<8x1xf32>
    %cst_18 = arith.constant 9.600000e+01 : f32
    %33 = vector.broadcast %cst_18 : f32 to vector<8x1xf32>
    %34 = arith.mulf %33, %32 : vector<8x1xf32>
    %35 = arith.subf %31, %34 : vector<8x1xf32>
    %cst_19 = arith.constant 3.125000e-02 : f32
    %36 = vector.broadcast %cst_19 : f32 to vector<8x1xf32>
    %37 = arith.mulf %35, %36 : vector<8x1xf32>
    %cst_20 = arith.constant 9.99999974E-6 : f32
    %38 = vector.broadcast %cst_20 : f32 to vector<8x1xf32>
    %39 = arith.addf %37, %38 : vector<8x1xf32>
    %40 = math.rsqrt %39 : vector<8x1xf32>
    %41 = vector.broadcast %40 : vector<8x1xf32> to vector<8x128xf32>
    %42 = arith.mulf %28, %41 : vector<8x128xf32>
    %c0_21 = arith.constant 0 : index
    %c0_22 = arith.constant 0 : index
    %43 = vector.load %arg6[%c0_21, %c0_22] : memref<1x128xf32, #tpu.memory_space<vmem>>, vector<1x128xf32>
    %44 = vector.broadcast %43 : vector<1x128xf32> to vector<8x128xf32>
    %45 = arith.mulf %42, %44 : vector<8x128xf32>
    %c0_23 = arith.constant 0 : index
    %c0_24 = arith.constant 0 : index
    %46 = vector.load %arg7[%c0_23, %c0_24] : memref<1x128xf32, #tpu.memory_space<vmem>>, vector<1x128xf32>
    %47 = vector.broadcast %46 : vector<1x128xf32> to vector<8x128xf32>
    %48 = arith.addf %45, %47 : vector<8x128xf32>
    %c0_25 = arith.constant 0 : index
    %c0_26 = arith.constant 0 : index
    %49 = vector.load %arg8[%c0_25, %c0_26] : memref<8x128xf32, #tpu.memory_space<vmem>>, vector<8x128xf32>
    tpu.vector_store %arg8[%c0_25, %c0_26], %48 {strides = array<i32>} : memref<8x128xf32, #tpu.memory_space<vmem>>, vector<8x128xf32>,
    return
  }
  func.func @transform_0(%arg0: i32) -> (i32, i32) {
    %c0_i32 = arith.constant 0 : i32
    %c0_i32_0 = arith.constant 0 : i32
    return %arg0, %c0_i32 : i32, i32
  }
  func.func @transform_1(%arg0: i32) -> (i32, i32) {
    %c0_i32 = arith.constant 0 : i32
    %c0_i32_0 = arith.constant 0 : i32
    %c0_i32_1 = arith.constant 0 : i32
    return %c0_i32, %c0_i32_0 : i32, i32
  }
  func.func @transform_2(%arg0: i32) -> (i32, i32) {
    %c0_i32 = arith.constant 0 : i32
    %c0_i32_0 = arith.constant 0 : i32
    %c0_i32_1 = arith.constant 0 : i32
    return %c0_i32, %c0_i32_0 : i32, i32
  }
  func.func @transform_3(%arg0: i32) -> (i32, i32) {
    %c0_i32 = arith.constant 0 : i32
    %c0_i32_0 = arith.constant 0 : i32
    %c0_i32_1 = arith.constant 0 : i32
    return %c0_i32, %c0_i32_0 : i32, i32
  }
  func.func @transform_4(%arg0: i32) -> (i32, i32) {
    %c0_i32 = arith.constant 0 : i32
    %c0_i32_0 = arith.constant 0 : i32
    %c0_i32_1 = arith.constant 0 : i32
    return %c0_i32, %c0_i32_0 : i32, i32
  }
  func.func @transform_5(%arg0: i32) -> (i32, i32) {
    %c0_i32 = arith.constant 0 : i32
    %c0_i32_0 = arith.constant 0 : i32
    %c0_i32_1 = arith.constant 0 : i32
    return %c0_i32, %c0_i32_0 : i32, i32
  }
  func.func @transform_6(%arg0: i32) -> (i32, i32) {
    %c0_i32 = arith.constant 0 : i32
    %c0_i32_0 = arith.constant 0 : i32
    %c0_i32_1 = arith.constant 0 : i32
    return %c0_i32, %c0_i32_0 : i32, i32
  }
  func.func @transform_7(%arg0: i32) -> (i32, i32) {
    %c0_i32 = arith.constant 0 : i32
    %c0_i32_0 = arith.constant 0 : i32
    return %arg0, %c0_i32 : i32, i32
  }
}

</mosaic_0001>

<bundles_post_ra>
// kernel: tpu_custom_call.1
= control target key start
LH: loop header
LB: loop body
LE: loop exit
PB: predicated region body
PF: predicated region fallthrough
CT: control target
= control target key end

     0   :  { %12 = vsyncpa [#allocation3], 0  ;;  %s1328_s0 = inlined_call_operand.hbm [shape: f32[16,128], index: 0, kind: input, shape index: {}]   ;;  %s1329_s1 = inlined_call_operand.hbm [shape: bf16[128,128], index: 1, kind: input, shape index: {}]   ;;  %s1330_s2 = inlined_call_operand.vmem [shape: f32[1,128], index: 2, kind: input, shape index: {}]   ;;  %s1331_s3 = inlined_call_operand.hbm [shape: bf16[128,128], index: 3, kind: input, shape index: {}]   ;;  %s1332_s4 = inlined_call_operand.vmem [shape: f32[1,128], index: 4, kind: input, shape index: {}]   ;;  %s1333_s5 = inlined_call_operand.vmem [shape: f32[1,128], index: 5, kind: input, shape index: {}]   ;;  %s1334_s6 = inlined_call_operand.vmem [shape: f32[1,128], index: 6, kind: input, shape index: {}]   ;;  %s1335_s7 = inlined_call_operand.hbm [shape: f32[16,128], index: 7, kind: output, shape index: {}]  }
   0x1   :  { %14 = vsyncpa [#allocation3 + $0x1], 0 }
   0x2   :  { %15 = vsyncpa [#allocation6], 0 }
   0x3   :  { %16 = vsyncpa [#allocation4], 0 }
   0x4   :  { %18 = vsyncpa [#allocation4 + $0x1], 0  ;;  %s1080_s24 = smov 0   ;;  %s1082_s25 = smov 0  }
   0x5   :  { %s1084_s26 = smov 0   ;;  %s1086_s27 = smov 0  }
   0x6 LB: > { %s1101_s28 = sadd.s32 4294967295, %s1030_s27   ;;  %s689_s29 = sadd.s32 4294967294, %s1030_s27   ;;  %s1030_s27 = sphi %s1086_s27, %s1355_s27   ;;  %s1026_s26 = sphi %s1084_s26, %s1354_s26   ;;  %s1022_s25 = sphi %s1082_s25, %s1353_s25   ;;  %s1018_s24 = sphi %s1080_s24, %s1352_s24  }
   0x7   : > { %p44_p0 = scmp.ne.s32.totalorder %s1022_s25, %s1018_s24  ;;  %p1336_p1 = scmp.eq.s32.totalorder %s1101_s28, 0 }
   0x8   : > { %p200_p3 = scmp.eq.s32.totalorder %s689_s29, 1  ;;  %p690_p5 = scmp.ge.s32.totalorder %s1030_s27, 1 }
   0x9   : > { %p1110_p4 = por %p1336_p1, %p44_p0  ;;  %p207_p7 = scmp.lt.s32.totalorder %s1030_s27, 3 }
   0xa   : > { %p1115_p6 = por %p200_p3, %p44_p0  ;;  %s1032_s10 = smov [#allocation5]  }
   0xb   : > { %s1339_s30 = scalar_select %p1110_p4, 1, 0 }
   0xc   : > { %s1340_s8 = scalar_select %p1115_p6, 1, 0 }
   0xd   : > { %p1120_p8 = pnand %p690_p5, %p207_p7  ;;  %s219_s11 = sshll.u32 %s1032_s10, 4  ;;  %s1124_s11 = int_to_ptr.vmem [resolvable:$true] %s219_s11 }
   0xe   : > { %s1033_s13 = smov [#allocation7]   ;;  %s874_s17 = scalar_lea.hbm %s1329_s1, 1024 }
   0xf   : > { %p795_p9 = pneg %p1120_p8  ;;  %s235_s14 = sshll.u32 %s1033_s13, 4  ;;  %s1135_s14 = int_to_ptr.vmem [resolvable:$true] %s235_s14 }
  0x10   : > { %p875_p12 = scmp.ne.s32.totalorder %s1329_s1, %s874_s17  ;;  %p881_p5 = scmp.lt.u32.totalorder %s874_s17, %s1329_s1 }
  0x11   : > { %p1131_p11 = pnand %p795_p9, %p1336_p1 }
  0x13   : > { %p876_p13 = pneg %p1131_p11 }
  0x15   : > { %p877_p0 = pnand %p876_p13, %p875_p12 }
  0x17   : > { %p878_p3 = pneg %p877_p0 }
  0x19   : > { %p883_p7 = pnand %p881_p5, %p878_p3 }
  0x1b   : > { %886 = shalt.err (!%p883_p7)
}
  0x1c   : > { %s887_s22 = scalar_lea.vmem %s1124_s11, 1024  ;;  %p895_p2 = scmp.lt.s32.totalorder %s1124_s11, %s1124_s11 }
  0x1d   : > { %p888_p9 = scmp.ne.s32.totalorder %s1124_s11, %s887_s22  ;;  %p896_p12 = scmp.lt.s32.totalorder %s887_s22, %s887_s22 }
  0x1f   : > { %p890_p10 = pnand %p888_p9, %p876_p13  ;;  %p897_p0 = por %p896_p12, %p895_p2 }
  0x21   : > { %p891_p1 = pneg %p890_p10 }
  0x23   : > { %p898_p6 = pnand %p897_p0, %p891_p1 }
  0x25   : > { %901 = shalt.err (!%p898_p6)
}
  0x26   : > { %s1034_s23 = smov 64   ;;  %s1035_s29 = smov 4  }
  0x27   : > { %798 = dma.hbm_to_vmem [thread:$0]  (!%p1131_p11), %s1329_s1, 1024, %s1124_s11, [#allocation6], %s1034_s23, %s1034_s23, %s1035_s29  }
  0x28   : > { %s902_s17 = scalar_lea.hbm %s1331_s3, 1024 }
  0x29   : > { %p903_p2 = scmp.ne.s32.totalorder %s1331_s3, %s902_s17  ;;  %p909_p10 = scmp.lt.u32.totalorder %s902_s17, %s1331_s3 }
  0x2b   : > { %p905_p1 = pnand %p903_p2, %p876_p13 }
  0x2d   : > { %p906_p6 = pneg %p905_p1 }
  0x2f   : > { %p911_p3 = pnand %p909_p10, %p906_p6 }
  0x31   : > { %914 = shalt.err (!%p911_p3)
}
  0x32   : > { %s915_s11 = scalar_lea.vmem %s1135_s14, 1024  ;;  %p923_p12 = scmp.lt.s32.totalorder %s1135_s14, %s1135_s14 }
  0x33   : > { %p916_p5 = scmp.ne.s32.totalorder %s1135_s14, %s915_s11  ;;  %p924_p0 = scmp.lt.s32.totalorder %s915_s11, %s915_s11 }
  0x35   : > { %p918_p7 = pnand %p916_p5, %p876_p13  ;;  %p925_p2 = por %p924_p0, %p923_p12 }
  0x37   : > { %p919_p9 = pneg %p918_p7 }
  0x39   : > { %p926_p1 = pnand %p925_p2, %p919_p9 }
  0x3b   : > { %929 = shalt.err (!%p926_p1)
}
  0x3c   : > { %801 = dma.hbm_to_vmem [thread:$0]  (!%p1131_p11), %s1331_s3, 1024, %s1135_s14, [#allocation6], %s1034_s23, %s1034_s23, %s1035_s29  }
  0x3d   : > { %s1190_s13 = sadd.s32 1, %s1030_s27   ;;  %s31_s12 = sadd.s32 1, %s1026_s26 }
  0x3e   : > { %s28_s15 = ssub.s32 %s1030_s27, %s1190_s13  ;;  %p38_p13 = scmp.ne.s32.totalorder %s1026_s26, %s1022_s25 }
  0x3f   : > { %p29_p6 = scmp.eq.s32.totalorder %s28_s15, 0  ;;  %p39_p10 = scmp.eq.s32.totalorder %s1030_s27, 0 }
  0x40   : > { %p1343_p3 = scmp.eq.s32.totalorder %s1101_s28, 1  ;;  %p812_p7 = scmp.lt.s32.totalorder %s1030_s27, 2 }
  0x41   : > { %s1206_s17 = scalar_select %p29_p6, %s1026_s26, %s31_s12  }
  0x42   : > { %p1200_p5 = por %p1343_p3, %p38_p13  ;;  %p40_p9 = por %p39_p10, %p38_p13 }
  0x43   : > { %s258_s18 = sand.u32 1, %s1026_s26   ;;  %s695_s14 = sshll.u32 %s1030_s27, 7 }
  0x44   : > { %s1344_s16 = scalar_select %p1200_p5, 1, 0 }
  0x45   : > { %s694_s19 = sshll.u32 %s258_s18, 3  ;;  %s1213_s20 = scalar_lea.hbm %s1328_s0, %s695_s14 }
  0x46   : > { %s262_s21 = scalar_lea.vmem [#allocation2], %s694_s19  ;;  %p1217_p11 = pnand %p812_p7, %p40_p9 }
  0x47   : > { %s269_s11 = sshll.u32 %s262_s21, 4  ;;  %s259_s10 = scalar_lea.sflag [#allocation3], %s258_s18  ;;  %s1215_s11 = int_to_ptr.vmem [resolvable:$true] %s269_s11 }
  0x48   : > { %s930_s12 = scalar_lea.hbm %s1213_s20, 128  ;;  %p932_p0 = pneg %p1217_p11 }
  0x49   : > { %p931_p12 = scmp.ne.s32.totalorder %s1213_s20, %s930_s12  ;;  %s935_s14 = scalar_lea.hbm %s1328_s0, 256 }
  0x4a   : > { %p936_p13 = scmp.lt.u32.totalorder %s1213_s20, %s1328_s0  ;;  %p937_p6 = scmp.lt.u32.totalorder %s935_s14, %s930_s12 }
  0x4b   : > { %p933_p2 = pnand %p932_p0, %p931_p12  ;;  %p939_p3 = scmp.lt.u32.totalorder %s930_s12, %s1213_s20 }
  0x4c   : > { %p938_p10 = por %p937_p6, %p936_p13 }
  0x4d   : > { %p934_p1 = pneg %p933_p2 }
  0x4e   : > { %p940_p7 = por %p939_p3, %p938_p10 }
  0x50   : > { %p941_p9 = pnand %p940_p7, %p934_p1 }
  0x52   : > { %944 = shalt.err (!%p941_p9)
}
  0x53   : > { %s945_s18 = scalar_lea.vmem %s1215_s11, 128  ;;  %s1036_s21 = smov [#allocation2]  }
  0x54   : > { %p946_p12 = scmp.ne.s32.totalorder %s1215_s11, %s945_s18  ;;  %s950_s15 = sshll.u32 %s1036_s21, 4  ;;  %s951_s15 = int_to_ptr.vmem [resolvable:$false] %s950_s15 }
  0x55   : > { %s952_s19 = scalar_lea.vmem %s951_s15, 256  ;;  %p953_p4 = scmp.lt.s32.totalorder %s1215_s11, %s951_s15 }
  0x56   : > { %p948_p2 = pnand %p946_p12, %p932_p0  ;;  %p954_p13 = scmp.lt.s32.totalorder %s952_s19, %s945_s18 }
  0x58   : > { %p949_p5 = pneg %p948_p2  ;;  %p955_p6 = por %p954_p13, %p953_p4 }
  0x5a   : > { %p956_p10 = pnand %p955_p6, %p949_p5 }
  0x5c   : > { %959 = shalt.err (!%p956_p10)
}
  0x5d   : > { %805 = dma.hbm_to_vmem [thread:$0]  (!%p1217_p11), %s1213_s20, 128, %s1215_s11, %s259_s10  }
  0x5e   : > { %278 = sbr.rel (%p1120_p8) target bundleno = 915 (0x393), region = 48  ;;  %s1249_s12 = sand.u32 (!%p1120_p8), 1, %s1022_s25  }
  0x5f   : > { %s697_s14 = sshll.u32 (!%p1120_p8), %s1249_s12, 3  ;;  %s281_s23 = scalar_lea.sflag (!%p1120_p8), [#allocation3], %s1249_s12 }
  0x60   : > { %s1255_s29 = scalar_lea.vmem (!%p1120_p8), [#allocation2], %s697_s14  ;;  %p1346_p4 = scmp.ne.s32.totalorder (!%p1120_p8), %s1339_s30, 0 }
  0x65   : > { %1005 = dma.done.wait (%p1346_p4), %s281_s23, 128  }
  0x66   : > { %1007 = vsyncadd (%p1346_p4), %s281_s23, 4294967168  ;;  %p1347_p5 = scmp.eq.s32.totalorder %s1101_s28, 0 }
  0x68   : > { %1009 = dma.done.wait (%p1347_p5), [#allocation6], 2048   ;;  %p1348_p8 = pmov %p1347_p5 }
  0x69   : > { %v1037_v0 = vmov 0.0   ;;  %vm1038_vm0 = vmmov 0   ;;  %v854_v1 = vld [vmem:[#allocation5] sm:$0xff]   ;;  %v855_v2 = vld [vmem:[#allocation5 + $0x8] sm:$0xff]   ;;  %v856_v3 = vld [vmem:[#allocation5 + $0x10] sm:$0xff]   ;;  %s722_s15 = sshll.u32 %s1101_s28, 7 }
  0x6a   : > { %1011 = vsyncadd (%p1348_p8), [#allocation6], 4294965248  ;;  %743 = vmatprep.subr.bf16.mxu0 %v1037_v0  ;;  %759 = vmatprep.mubr.msk.bf16.mxu0 %vm1038_vm0, %v1037_v0  ;;  %v862_v4 = vld [vmem:[#allocation7] sm:$0xff]   ;;  %v857_v5 = vld [vmem:[#allocation5 + $0x18] sm:$0xff]   ;;  %s322_s19 = scalar_lea.vmem [#allocation8], %s697_s14  ;;  %s1284_s9 = scalar_lea.hbm %s1335_s7, %s722_s15 }
  0x6b   : > { %763 = vmatprep.subr.bf16.mxu1 %v1037_v0  ;;  %779 = vmatprep.mubr.msk.bf16.mxu1 %vm1038_vm0, %v1037_v0  ;;  %v863_v6 = vld [vmem:[#allocation7 + $0x8] sm:$0xff]   ;;  %v858_v7 = vld [vmem:[#allocation5 + $0x20] sm:$0xff]   ;;  %v864_v8 = vld [vmem:[#allocation7 + $0x10] sm:$0xff]   ;;  %s600_s23 = sshll.u32 %s322_s19, 4  ;;  %s587_s20 = scalar_lea.sflag [#allocation4], %s1249_s12  ;;  %s1286_s23 = int_to_ptr.vmem [resolvable:$true] %s600_s23 }
  0x6c   : > { %744 = vmatpush3.bf16.msra.mxu0 %v854_v1  ;;  %764 = vmatpush3.bf16.msra.mxu1 %v862_v4  ;;  %v859_v9 = vld [vmem:[#allocation5 + $0x28] sm:$0xff]   ;;  %v860_v10 = vld [vmem:[#allocation5 + $0x30] sm:$0xff]   ;;  %v861_v11 = vld [vmem:[#allocation5 + $0x38] sm:$0xff]   ;;  %s960_s11 = scalar_lea.vmem %s1286_s23, 128  ;;  %p1349_p0 = scmp.ne.s32.totalorder %s1344_s16, 0 }
  0x6d   : > { %745 = vmatprep.subr.bf16.mxu0 %v1037_v0  ;;  %765 = vmatprep.subr.bf16.mxu1 %v1037_v0  ;;  %v324_v12 = vld [vmem:[%s1255_s29] sm:$0xff]  ;;  %v866_v15 = vld [vmem:[#allocation7 + $0x20] sm:$0xff]   ;;  %v867_v16 = vld [vmem:[#allocation7 + $0x28] sm:$0xff]   ;;  %p961_p11 = scmp.ne.s32.totalorder %s1286_s23, %s960_s11  ;;  %s1039_s28 = smov [#allocation8]  }
  0x6e   : > { %v325_v13 = vpack.c.bf16 %v324_v12, %v324_v12  ;;  %v865_v14 = vld [vmem:[#allocation7 + $0x18] sm:$0xff]   ;;  %v868_v17 = vld [vmem:[#allocation7 + $0x30] sm:$0xff]   ;;  %s964_s14 = sshll.u32 %s1039_s28, 4  ;;  %s965_s14 = int_to_ptr.vmem [resolvable:$false] %s964_s14 }
  0x6f   : > { %v869_v18 = vld [vmem:[#allocation7 + $0x38] sm:$0xff]   ;;  %v701_v19 = vld [vmem:[%s1330_s2] ss:$0 sm:$0xff]  ;;  %p962_p1 = pnand %p961_p11, %p1349_p0  ;;  %s966_s22 = scalar_lea.vmem %s965_s14, 256 }
  0x70   : > { %746 = vmatpush3.bf16.msra.mxu0 %v855_v2  ;;  %766 = vmatpush3.bf16.msra.mxu1 %v863_v6  ;;  %v710_v31 = vld [vmem:[%s1332_s4] ss:$0 sm:$0xff]  ;;  %p967_p7 = scmp.lt.s32.totalorder %s1286_s23, %s965_s14  ;;  %p968_p9 = scmp.lt.s32.totalorder %s966_s22, %s960_s11 }
  0x71   : > { %747 = vmatprep.subr.bf16.mxu0 %v1037_v0  ;;  %767 = vmatprep.subr.bf16.mxu1 %v1037_v0  ;;  %v719_v49 = vld [vmem:[%s1333_s5] ss:$0 sm:$0xff]  ;;  %p963_p3 = pneg %p962_p1 }
  0x72   : > { %v720_v51 = vld [vmem:[%s1334_s6] ss:$0 sm:$0xff]  ;;  %p969_p12 = por %p968_p9, %p967_p7 }
  0x74   : > { %748 = vmatpush3.bf16.msra.mxu0 %v856_v3  ;;  %768 = vmatpush3.bf16.msra.mxu1 %v864_v8  ;;  %p970_p2 = pnand %p969_p12, %p963_p3 }
  0x75   : > { %749 = vmatprep.subr.bf16.mxu0 %v1037_v0  ;;  %769 = vmatprep.subr.bf16.mxu1 %v1037_v0 }
  0x78   : > { %750 = vmatpush3.bf16.msra.mxu0 %v857_v5  ;;  %770 = vmatpush3.bf16.msra.mxu1 %v865_v14 }
  0x79   : > { %751 = vmatprep.subr.bf16.mxu0 %v1037_v0  ;;  %771 = vmatprep.subr.bf16.mxu1 %v1037_v0 }
  0x7c   : > { %752 = vmatpush3.bf16.msra.mxu0 %v858_v7  ;;  %772 = vmatpush3.bf16.msra.mxu1 %v866_v15 }
  0x7d   : > { %753 = vmatprep.subr.bf16.mxu0 %v1037_v0  ;;  %773 = vmatprep.subr.bf16.mxu1 %v1037_v0 }
  0x80   : > { %754 = vmatpush3.bf16.msra.mxu0 %v859_v9  ;;  %774 = vmatpush3.bf16.msra.mxu1 %v867_v16 }
  0x81   : > { %755 = vmatprep.subr.bf16.mxu0 %v1037_v0  ;;  %775 = vmatprep.subr.bf16.mxu1 %v1037_v0 }
  0x84   : > { %756 = vmatpush3.bf16.msra.mxu0 %v860_v10  ;;  %776 = vmatpush3.bf16.msra.mxu1 %v868_v17 }
  0x85   : > { %757 = vmatprep.subr.bf16.mxu0 %v1037_v0  ;;  %777 = vmatprep.subr.bf16.mxu1 %v1037_v0 }
  0x88   : > { %758 = vmatpush3.bf16.msra.mxu0 %v861_v11  ;;  %778 = vmatpush3.bf16.msra.mxu1 %v869_v18 }
  0x8b   : > { %760 = vmatmul.mubr.bf16.vlgmr.msra.gmra.mrb[0].mxu0 %v325_v13 }
 0x15e   : > { %v431_v20 = vpop.f32.mrb[0].mxu0 }
 0x15f   : > { %v432_v21 = vadd.f32 %v701_v19, %v431_v20  ;;  %v761_v22 = vpop.f32.mrb[1].mxu0 }
 0x160   : > { %v434_v23 = vpop.f32.mrb[2].mxu0 }
 0x161   : > { %v438_v24 = vmul.f32 0.70710677, %v432_v21  ;;  %v762_v25 = vpop.f32.mrb[3].mxu0  ;;  %v437_v27 = vmul.f32 0.5, %v432_v21 }
 0x163   : > { %870 = verf.f32 %v438_v24 }
 0x16d   : > { %v871_v26 = vpop.eup %870 }
 0x16e   : > { %v440_v28 = vadd.f32 1.0, %v871_v26 }
 0x170   : > { %v441_v29 = vmul.f32 %v440_v28, %v437_v27 }
 0x172   : > { %v442_v30 = vpack.c.bf16 %v441_v29, %v441_v29 }
 0x174   : > { %780 = vmatmul.mubr.bf16.vlgmr.msra.gmra.mrb[0].mxu1 %v442_v30 }
 0x247   : > { %v548_v32 = vpop.f32.mrb[0].mxu1 }
 0x248   : > { %v549_v33 = vadd.f32 %v710_v31, %v548_v32  ;;  %v781_v34 = vpop.f32.mrb[1].mxu1 }
 0x249   : > { %v551_v35 = vpop.f32.mrb[2].mxu1 }
 0x24a   : > { %v782_v36 = vpop.f32.mrb[3].mxu1  ;;  %v554_v37 = vadd.f32 %v549_v33, %v324_v12 }
 0x24c   : > { %555 = vadd.xlane.f32.xlu0 %v554_v37 }
 0x2d9   : > { %v556_v38 = vpop.xlane.xlu0 %555 }
 0x2da   : > { %v557_v39 = vmul.f32 0.03125, %v556_v38 }
 0x2dc   : > { %v558_v40 = vsub.f32 %v554_v37, %v557_v39  ;;  %v562_v42 = vmul.f32 %v557_v39, %v557_v39 }
 0x2de   : > { %v559_v41 = vmul.f32 %v558_v40, %v558_v40  ;;  %v563_v43 = vmul.f32 96.0, %v562_v42 }
 0x2e0   : > { %560 = vadd.xlane.f32.xlu0 %v559_v41 }
 0x36d   : > { %v561_v44 = vpop.xlane.xlu0 %560 }
 0x36e   : > { %v564_v45 = vsub.f32 %v561_v44, %v563_v43 }
 0x370   : > { %v565_v46 = vmul.f32 0.03125, %v564_v45 }
 0x372   : > { %v566_v47 = vadd.f32 1e-05, %v565_v46 }
 0x374   : > { %872 = vrsqrt.f32 %v566_v47 }
 0x37e   : > { %v873_v48 = vpop.eup %872 }
 0x37f   : > { %v568_v50 = vmul.f32 %v873_v48, %v558_v40 }
 0x381   : > { %v576_v52 = vmul.f32 %v719_v49, %v568_v50 }
 0x383   : > { %v584_v53 = vadd.f32 %v720_v51, %v576_v52 }
 0x385   : > { %585 = vst [vmem:[%s322_s19] sm:$0xff] %v584_v53 }
 0x386   : > { %973 = shalt.err (!%p970_p2)
}
 0x387   : > { %s974_s12 = scalar_lea.hbm %s1284_s9, 128  ;;  %s978_s21 = scalar_lea.hbm %s1335_s7, 256 }
 0x388   : > { %p975_p13 = scmp.ne.s32.totalorder %s1284_s9, %s974_s12  ;;  %p979_p4 = scmp.lt.u32.totalorder %s1284_s9, %s1335_s7 }
 0x389   : > { %p980_p5 = scmp.lt.u32.totalorder %s978_s21, %s974_s12  ;;  %p982_p11 = scmp.lt.u32.totalorder %s974_s12, %s1284_s9 }
 0x38a   : > { %p976_p6 = pnand %p975_p13, %p1349_p0 }
 0x38b   : > { %p981_p8 = por %p980_p5, %p979_p4 }
 0x38c   : > { %p977_p10 = pneg %p976_p6 }
 0x38d   : > { %p983_p1 = por %p982_p11, %p981_p8 }
 0x38f   : > { %p984_p3 = pnand %p983_p1, %p977_p10 }
 0x391   : > { %987 = shalt.err (!%p984_p3)
}
 0x392   : > { %793 = dma.vmem_to_hbm [thread:$0]  (%p1349_p0), %s1286_s23, 128, %s1284_s9, %s587_s20  }
 0x393 PF: > { %s612_s29 = sand.u32 1, %s1018_s24   ;;  %p1350_p7 = scmp.ne.s32.totalorder %s1340_s8, 0 }
 0x394   : > { %p1351_p9 = scmp.ge.s32.totalorder %s1030_s27, 2  ;;  %s613_s30 = scalar_lea.sflag [#allocation4], %s612_s29 }
 0x396   : > { %p807_p12 = pnand %p1351_p9, %p1350_p7 }
 0x398   : > { %1013 = dma.done.wait (!%p807_p12), %s613_s30, 128  }
 0x399   : > { %1015 = vsyncadd (!%p807_p12), %s613_s30, 4294967168  ;;  %p21_p2 = scmp.ge.s32.totalorder %s1190_s13, 4   ;;  %s1352_s24 = smov %s1022_s25 }
 0x39a   : > { %s1353_s25 = smov %s1026_s26  ;;  %s1354_s26 = smov %s1206_s17 }
 0x39b   : > { %s1355_s27 = smov %s1190_s13  ;;  %23 = sbr.rel (!%p21_p2) target bundleno = 6 (0x6), region = 101 }
 0x3a2   :  { %618 = vsyncpa [#allocation3], 1 }
 0x3a3   :  { %620 = vsyncpa [#allocation3 + $0x1], 1 }
 0x3a4   :  { %621 = vsyncpa [#allocation6], 1 }
 0x3a5   :  { %622 = vsyncpa [#allocation4], 1 }
 0x3a6   :  { %624 = vsyncpa [#allocation4 + $0x1], 1 }

// kernel: tpu_custom_call.1
= control target key start
LH: loop header
LB: loop body
LE: loop exit
PB: predicated region body
PF: predicated region fallthrough
CT: control target
= control target key end

     0   :  { %12 = vsyncpa [#allocation3], 0  ;;  %s1328_s0 = inlined_call_operand.hbm [shape: f32[16,128], index: 0, kind: input, shape index: {}]   ;;  %s1329_s1 = inlined_call_operand.hbm [shape: bf16[128,128], index: 1, kind: input, shape index: {}]   ;;  %s1330_s2 = inlined_call_operand.vmem [shape: f32[1,128], index: 2, kind: input, shape index: {}]   ;;  %s1331_s3 = inlined_call_operand.hbm [shape: bf16[128,128], index: 3, kind: input, shape index: {}]   ;;  %s1332_s4 = inlined_call_operand.vmem [shape: f32[1,128], index: 4, kind: input, shape index: {}]   ;;  %s1333_s5 = inlined_call_operand.vmem [shape: f32[1,128], index: 5, kind: input, shape index: {}]   ;;  %s1334_s6 = inlined_call_operand.vmem [shape: f32[1,128], index: 6, kind: input, shape index: {}]   ;;  %s1335_s7 = inlined_call_operand.hbm [shape: f32[16,128], index: 7, kind: output, shape index: {}]  }
   0x1   :  { %14 = vsyncpa [#allocation3 + $0x1], 0 }
   0x2   :  { %15 = vsyncpa [#allocation6], 0 }
   0x3   :  { %16 = vsyncpa [#allocation4], 0 }
   0x4   :  { %18 = vsyncpa [#allocation4 + $0x1], 0  ;;  %s1080_s24 = smov 0   ;;  %s1082_s25 = smov 0  }
   0x5   :  { %s1084_s26 = smov 0   ;;  %s1086_s27 = smov 0  }
   0x6 LB: > { %s1101_s28 = sadd.s32 4294967295, %s1030_s27   ;;  %s689_s29 = sadd.s32 4294967294, %s1030_s27   ;;  %s1030_s27 = sphi %s1086_s27, %s1355_s27   ;;  %s1026_s26 = sphi %s1084_s26, %s1354_s26   ;;  %s1022_s25 = sphi %s1082_s25, %s1353_s25   ;;  %s1018_s24 = sphi %s1080_s24, %s1352_s24  }
   0x7   : > { %p44_p0 = scmp.ne.s32.totalorder %s1022_s25, %s1018_s24  ;;  %p1336_p1 = scmp.eq.s32.totalorder %s1101_s28, 0 }
   0x8   : > { %p200_p3 = scmp.eq.s32.totalorder %s689_s29, 1  ;;  %p690_p5 = scmp.ge.s32.totalorder %s1030_s27, 1 }
   0x9   : > { %p1110_p4 = por %p1336_p1, %p44_p0  ;;  %p207_p7 = scmp.lt.s32.totalorder %s1030_s27, 3 }
   0xa   : > { %p1115_p6 = por %p200_p3, %p44_p0  ;;  %s1032_s10 = smov [#allocation5]  }
   0xb   : > { %s1339_s30 = scalar_select %p1110_p4, 1, 0 }
   0xc   : > { %s1340_s8 = scalar_select %p1115_p6, 1, 0 }
   0xd   : > { %p1120_p8 = pnand %p690_p5, %p207_p7  ;;  %s219_s11 = sshll.u32 %s1032_s10, 4  ;;  %s1124_s11 = int_to_ptr.vmem [resolvable:$true] %s219_s11 }
   0xe   : > { %s1033_s13 = smov [#allocation7]   ;;  %s874_s17 = scalar_lea.hbm %s1329_s1, 1024 }
   0xf   : > { %p795_p9 = pneg %p1120_p8  ;;  %s235_s14 = sshll.u32 %s1033_s13, 4  ;;  %s1135_s14 = int_to_ptr.vmem [resolvable:$true] %s235_s14 }
  0x10   : > { %p875_p12 = scmp.ne.s32.totalorder %s1329_s1, %s874_s17  ;;  %p881_p5 = scmp.lt.u32.totalorder %s874_s17, %s1329_s1 }
  0x11   : > { %p1131_p11 = pnand %p795_p9, %p1336_p1 }
  0x13   : > { %p876_p13 = pneg %p1131_p11 }
  0x15   : > { %p877_p0 = pnand %p876_p13, %p875_p12 }
  0x17   : > { %p878_p3 = pneg %p877_p0 }
  0x19   : > { %p883_p7 = pnand %p881_p5, %p878_p3 }
  0x1b   : > { %886 = shalt.err (!%p883_p7)
}
  0x1c   : > { %s887_s22 = scalar_lea.vmem %s1124_s11, 1024  ;;  %p895_p2 = scmp.lt.s32.totalorder %s1124_s11, %s1124_s11 }
  0x1d   : > { %p888_p9 = scmp.ne.s32.totalorder %s1124_s11, %s887_s22  ;;  %p896_p12 = scmp.lt.s32.totalorder %s887_s22, %s887_s22 }
  0x1f   : > { %p890_p10 = pnand %p888_p9, %p876_p13  ;;  %p897_p0 = por %p896_p12, %p895_p2 }
  0x21   : > { %p891_p1 = pneg %p890_p10 }
  0x23   : > { %p898_p6 = pnand %p897_p0, %p891_p1 }
  0x25   : > { %901 = shalt.err (!%p898_p6)
}
  0x26   : > { %s1034_s23 = smov 64   ;;  %s1035_s29 = smov 4  }
  0x27   : > { %798 = dma.hbm_to_vmem [thread:$0]  (!%p1131_p11), %s1329_s1, 1024, %s1124_s11, [#allocation6], %s1034_s23, %s1034_s23, %s1035_s29  }
  0x28   : > { %s902_s17 = scalar_lea.hbm %s1331_s3, 1024 }
  0x29   : > { %p903_p2 = scmp.ne.s32.totalorder %s1331_s3, %s902_s17  ;;  %p909_p10 = scmp.lt.u32.totalorder %s902_s17, %s1331_s3 }
  0x2b   : > { %p905_p1 = pnand %p903_p2, %p876_p13 }
  0x2d   : > { %p906_p6 = pneg %p905_p1 }
  0x2f   : > { %p911_p3 = pnand %p909_p10, %p906_p6 }
  0x31   : > { %914 = shalt.err (!%p911_p3)
}
  0x32   : > { %s915_s11 = scalar_lea.vmem %s1135_s14, 1024  ;;  %p923_p12 = scmp.lt.s32.totalorder %s1135_s14, %s1135_s14 }
  0x33   : > { %p916_p5 = scmp.ne.s32.totalorder %s1135_s14, %s915_s11  ;;  %p924_p0 = scmp.lt.s32.totalorder %s915_s11, %s915_s11 }
  0x35   : > { %p918_p7 = pnand %p916_p5, %p876_p13  ;;  %p925_p2 = por %p924_p0, %p923_p12 }
  0x37   : > { %p919_p9 = pneg %p918_p7 }
  0x39   : > { %p926_p1 = pnand %p925_p2, %p919_p9 }
  0x3b   : > { %929 = shalt.err (!%p926_p1)
}
  0x3c   : > { %801 = dma.hbm_to_vmem [thread:$0]  (!%p1131_p11), %s1331_s3, 1024, %s1135_s14, [#allocation6], %s1034_s23, %s1034_s23, %s1035_s29  }
  0x3d   : > { %s1190_s13 = sadd.s32 1, %s1030_s27   ;;  %s31_s12 = sadd.s32 1, %s1026_s26 }
  0x3e   : > { %s28_s15 = ssub.s32 %s1030_s27, %s1190_s13  ;;  %p38_p13 = scmp.ne.s32.totalorder %s1026_s26, %s1022_s25 }
  0x3f   : > { %p29_p6 = scmp.eq.s32.totalorder %s28_s15, 0  ;;  %p39_p10 = scmp.eq.s32.totalorder %s1030_s27, 0 }
  0x40   : > { %p1343_p3 = scmp.eq.s32.totalorder %s1101_s28, 1  ;;  %p812_p7 = scmp.lt.s32.totalorder %s1030_s27, 2 }
  0x41   : > { %s1206_s17 = scalar_select %p29_p6, %s1026_s26, %s31_s12  }
  0x42   : > { %p1200_p5 = por %p1343_p3, %p38_p13  ;;  %p40_p9 = por %p39_p10, %p38_p13 }
  0x43   : > { %s258_s18 = sand.u32 1, %s1026_s26   ;;  %s695_s14 = sshll.u32 %s1030_s27, 7 }
  0x44   : > { %s1344_s16 = scalar_select %p1200_p5, 1, 0 }
  0x45   : > { %s694_s19 = sshll.u32 %s258_s18, 3  ;;  %s1213_s20 = scalar_lea.hbm %s1328_s0, %s695_s14 }
  0x46   : > { %s262_s21 = scalar_lea.vmem [#allocation2], %s694_s19  ;;  %p1217_p11 = pnand %p812_p7, %p40_p9 }
  0x47   : > { %s269_s11 = sshll.u32 %s262_s21, 4  ;;  %s259_s10 = scalar_lea.sflag [#allocation3], %s258_s18  ;;  %s1215_s11 = int_to_ptr.vmem [resolvable:$true] %s269_s11 }
  0x48   : > { %s930_s12 = scalar_lea.hbm %s1213_s20, 128  ;;  %p932_p0 = pneg %p1217_p11 }
  0x49   : > { %p931_p12 = scmp.ne.s32.totalorder %s1213_s20, %s930_s12  ;;  %s935_s14 = scalar_lea.hbm %s1328_s0, 256 }
  0x4a   : > { %p936_p13 = scmp.lt.u32.totalorder %s1213_s20, %s1328_s0  ;;  %p937_p6 = scmp.lt.u32.totalorder %s935_s14, %s930_s12 }
  0x4b   : > { %p933_p2 = pnand %p932_p0, %p931_p12  ;;  %p939_p3 = scmp.lt.u32.totalorder %s930_s12, %s1213_s20 }
  0x4c   : > { %p938_p10 = por %p937_p6, %p936_p13 }
  0x4d   : > { %p934_p1 = pneg %p933_p2 }
  0x4e   : > { %p940_p7 = por %p939_p3, %p938_p10 }
  0x50   : > { %p941_p9 = pnand %p940_p7, %p934_p1 }
  0x52   : > { %944 = shalt.err (!%p941_p9)
}
  0x53   : > { %s945_s18 = scalar_lea.vmem %s1215_s11, 128  ;;  %s1036_s21 = smov [#allocation2]  }
  0x54   : > { %p946_p12 = scmp.ne.s32.totalorder %s1215_s11, %s945_s18  ;;  %s950_s15 = sshll.u32 %s1036_s21, 4  ;;  %s951_s15 = int_to_ptr.vmem [resolvable:$false] %s950_s15 }
  0x55   : > { %s952_s19 = scalar_lea.vmem %s951_s15, 256  ;;  %p953_p4 = scmp.lt.s32.totalorder %s1215_s11, %s951_s15 }
  0x56   : > { %p948_p2 = pnand %p946_p12, %p932_p0  ;;  %p954_p13 = scmp.lt.s32.totalorder %s952_s19, %s945_s18 }
  0x58   : > { %p949_p5 = pneg %p948_p2  ;;  %p955_p6 = por %p954_p13, %p953_p4 }
  0x5a   : > { %p956_p10 = pnand %p955_p6, %p949_p5 }
  0x5c   : > { %959 = shalt.err (!%p956_p10)
}
  0x5d   : > { %805 = dma.hbm_to_vmem [thread:$0]  (!%p1217_p11), %s1213_s20, 128, %s1215_s11, %s259_s10  }
  0x5e   : > { %278 = sbr.rel (%p1120_p8) target bundleno = 915 (0x393), region = 48  ;;  %s1249_s12 = sand.u32 (!%p1120_p8), 1, %s1022_s25  }
  0x5f   : > { %s697_s14 = sshll.u32 (!%p1120_p8), %s1249_s12, 3  ;;  %s281_s23 = scalar_lea.sflag (!%p1120_p8), [#allocation3], %s1249_s12 }
  0x60   : > { %s1255_s29 = scalar_lea.vmem (!%p1120_p8), [#allocation2], %s697_s14  ;;  %p1346_p4 = scmp.ne.s32.totalorder (!%p1120_p8), %s1339_s30, 0 }
  0x65   : > { %1005 = dma.done.wait (%p1346_p4), %s281_s23, 128  }
  0x66   : > { %1007 = vsyncadd (%p1346_p4), %s281_s23, 4294967168  ;;  %p1347_p5 = scmp.eq.s32.totalorder %s1101_s28, 0 }
  0x68   : > { %1009 = dma.done.wait (%p1347_p5), [#allocation6], 2048   ;;  %p1348_p8 = pmov %p1347_p5 }
  0x69   : > { %v1037_v0 = vmov 0.0   ;;  %vm1038_vm0 = vmmov 0   ;;  %v854_v1 = vld [vmem:[#allocation5] sm:$0xff]   ;;  %v855_v2 = vld [vmem:[#allocation5 + $0x8] sm:$0xff]   ;;  %v856_v3 = vld [vmem:[#allocation5 + $0x10] sm:$0xff]   ;;  %s722_s15 = sshll.u32 %s1101_s28, 7 }
  0x6a   : > { %1011 = vsyncadd (%p1348_p8), [#allocation6], 4294965248  ;;  %743 = vmatprep.subr.bf16.mxu0 %v1037_v0  ;;  %759 = vmatprep.mubr.msk.bf16.mxu0 %vm1038_vm0, %v1037_v0  ;;  %v862_v4 = vld [vmem:[#allocation7] sm:$0xff]   ;;  %v857_v5 = vld [vmem:[#allocation5 + $0x18] sm:$0xff]   ;;  %s322_s19 = scalar_lea.vmem [#allocation8], %s697_s14  ;;  %s1284_s9 = scalar_lea.hbm %s1335_s7, %s722_s15 }
  0x6b   : > { %763 = vmatprep.subr.bf16.mxu1 %v1037_v0  ;;  %779 = vmatprep.mubr.msk.bf16.mxu1 %vm1038_vm0, %v1037_v0  ;;  %v863_v6 = vld [vmem:[#allocation7 + $0x8] sm:$0xff]   ;;  %v858_v7 = vld [vmem:[#allocation5 + $0x20] sm:$0xff]   ;;  %v864_v8 = vld [vmem:[#allocation7 + $0x10] sm:$0xff]   ;;  %s600_s23 = sshll.u32 %s322_s19, 4  ;;  %s587_s20 = scalar_lea.sflag [#allocation4], %s1249_s12  ;;  %s1286_s23 = int_to_ptr.vmem [resolvable:$true] %s600_s23 }
  0x6c   : > { %744 = vmatpush3.bf16.msra.mxu0 %v854_v1  ;;  %764 = vmatpush3.bf16.msra.mxu1 %v862_v4  ;;  %v859_v9 = vld [vmem:[#allocation5 + $0x28] sm:$0xff]   ;;  %v860_v10 = vld [vmem:[#allocation5 + $0x30] sm:$0xff]   ;;  %v861_v11 = vld [vmem:[#allocation5 + $0x38] sm:$0xff]   ;;  %s960_s11 = scalar_lea.vmem %s1286_s23, 128  ;;  %p1349_p0 = scmp.ne.s32.totalorder %s1344_s16, 0 }
  0x6d   : > { %745 = vmatprep.subr.bf16.mxu0 %v1037_v0  ;;  %765 = vmatprep.subr.bf16.mxu1 %v1037_v0  ;;  %v324_v12 = vld [vmem:[%s1255_s29] sm:$0xff]  ;;  %v866_v15 = vld [vmem:[#allocation7 + $0x20] sm:$0xff]   ;;  %v867_v16 = vld [vmem:[#allocation7 + $0x28] sm:$0xff]   ;;  %p961_p11 = scmp.ne.s32.totalorder %s1286_s23, %s960_s11  ;;  %s1039_s28 = smov [#allocation8]  }
  0x6e   : > { %v325_v13 = vpack.c.bf16 %v324_v12, %v324_v12  ;;  %v865_v14 = vld [vmem:[#allocation7 + $0x18] sm:$0xff]   ;;  %v868_v17 = vld [vmem:[#allocation7 + $0x30] sm:$0xff]   ;;  %s964_s14 = sshll.u32 %s1039_s28, 4  ;;  %s965_s14 = int_to_ptr.vmem [resolvable:$false] %s964_s14 }
  0x6f   : > { %v869_v18 = vld [vmem:[#allocation7 + $0x38] sm:$0xff]   ;;  %v701_v19 = vld [vmem:[%s1330_s2] ss:$0 sm:$0xff]  ;;  %p962_p1 = pnand %p961_p11, %p1349_p0  ;;  %s966_s22 = scalar_lea.vmem %s965_s14, 256 }
  0x70   : > { %746 = vmatpush3.bf16.msra.mxu0 %v855_v2  ;;  %766 = vmatpush3.bf16.msra.mxu1 %v863_v6  ;;  %v710_v31 = vld [vmem:[%s1332_s4] ss:$0 sm:$0xff]  ;;  %p967_p7 = scmp.lt.s32.totalorder %s1286_s23, %s965_s14  ;;  %p968_p9 = scmp.lt.s32.totalorder %s966_s22, %s960_s11 }
  0x71   : > { %747 = vmatprep.subr.bf16.mxu0 %v1037_v0  ;;  %767 = vmatprep.subr.bf16.mxu1 %v1037_v0  ;;  %v719_v49 = vld [vmem:[%s1333_s5] ss:$0 sm:$0xff]  ;;  %p963_p3 = pneg %p962_p1 }
  0x72   : > { %v720_v51 = vld [vmem:[%s1334_s6] ss:$0 sm:$0xff]  ;;  %p969_p12 = por %p968_p9, %p967_p7 }
  0x74   : > { %748 = vmatpush3.bf16.msra.mxu0 %v856_v3  ;;  %768 = vmatpush3.bf16.msra.mxu1 %v864_v8  ;;  %p970_p2 = pnand %p969_p12, %p963_p3 }
  0x75   : > { %749 = vmatprep.subr.bf16.mxu0 %v1037_v0  ;;  %769 = vmatprep.subr.bf16.mxu1 %v1037_v0 }
  0x78   : > { %750 = vmatpush3.bf16.msra.mxu0 %v857_v5  ;;  %770 = vmatpush3.bf16.msra.mxu1 %v865_v14 }
  0x79   : > { %751 = vmatprep.subr.bf16.mxu0 %v1037_v0  ;;  %771 = vmatprep.subr.bf16.mxu1 %v1037_v0 }
  0x7c   : > { %752 = vmatpush3.bf16.msra.mxu0 %v858_v7  ;;  %772 = vmatpush3.bf16.msra.mxu1 %v866_v15 }
  0x7d   : > { %753 = vmatprep.subr.bf16.mxu0 %v1037_v0  ;;  %773 = vmatprep.subr.bf16.mxu1 %v1037_v0 }
  0x80   : > { %754 = vmatpush3.bf16.msra.mxu0 %v859_v9  ;;  %774 = vmatpush3.bf16.msra.mxu1 %v867_v16 }
  0x81   : > { %755 = vmatprep.subr.bf16.mxu0 %v1037_v0  ;;  %775 = vmatprep.subr.bf16.mxu1 %v1037_v0 }
  0x84   : > { %756 = vmatpush3.bf16.msra.mxu0 %v860_v10  ;;  %776 = vmatpush3.bf16.msra.mxu1 %v868_v17 }
  0x85   : > { %757 = vmatprep.subr.bf16.mxu0 %v1037_v0  ;;  %777 = vmatprep.subr.bf16.mxu1 %v1037_v0 }
  0x88   : > { %758 = vmatpush3.bf16.msra.mxu0 %v861_v11  ;;  %778 = vmatpush3.bf16.msra.mxu1 %v869_v18 }
  0x8b   : > { %760 = vmatmul.mubr.bf16.vlgmr.msra.gmra.mrb[0].mxu0 %v325_v13 }
 0x15e   : > { %v431_v20 = vpop.f32.mrb[0].mxu0 }
 0x15f   : > { %v432_v21 = vadd.f32 %v701_v19, %v431_v20  ;;  %v761_v22 = vpop.f32.mrb[1].mxu0 }
 0x160   : > { %v434_v23 = vpop.f32.mrb[2].mxu0 }
 0x161   : > { %v438_v24 = vmul.f32 0.70710677, %v432_v21  ;;  %v762_v25 = vpop.f32.mrb[3].mxu0  ;;  %v437_v27 = vmul.f32 0.5, %v432_v21 }
 0x163   : > { %870 = verf.f32 %v438_v24 }
 0x16d   : > { %v871_v26 = vpop.eup %870 }
 0x16e   : > { %v440_v28 = vadd.f32 1.0, %v871_v26 }
 0x170   : > { %v441_v29 = vmul.f32 %v440_v28, %v437_v27 }
 0x172   : > { %v442_v30 = vpack.c.bf16 %v441_v29, %v441_v29 }
 0x174   : > { %780 = vmatmul.mubr.bf16.vlgmr.msra.gmra.mrb[0].mxu1 %v442_v30 }
 0x247   : > { %v548_v32 = vpop.f32.mrb[0].mxu1 }
 0x248   : > { %v549_v33 = vadd.f32 %v710_v31, %v548_v32  ;;  %v781_v34 = vpop.f32.mrb[1].mxu1 }
 0x249   : > { %v551_v35 = vpop.f32.mrb[2].mxu1 }
 0x24a   : > { %v782_v36 = vpop.f32.mrb[3].mxu1  ;;  %v554_v37 = vadd.f32 %v549_v33, %v324_v12 }
 0x24c   : > { %555 = vadd.xlane.f32.xlu0 %v554_v37 }
 0x2d9   : > { %v556_v38 = vpop.xlane.xlu0 %555 }
 0x2da   : > { %v557_v39 = vmul.f32 0.03125, %v556_v38 }
 0x2dc   : > { %v558_v40 = vsub.f32 %v554_v37, %v557_v39  ;;  %v562_v42 = vmul.f32 %v557_v39, %v557_v39 }
 0x2de   : > { %v559_v41 = vmul.f32 %v558_v40, %v558_v40  ;;  %v563_v43 = vmul.f32 96.0, %v562_v42 }
 0x2e0   : > { %560 = vadd.xlane.f32.xlu0 %v559_v41 }
 0x36d   : > { %v561_v44 = vpop.xlane.xlu0 %560 }
 0x36e   : > { %v564_v45 = vsub.f32 %v561_v44, %v563_v43 }
 0x370   : > { %v565_v46 = vmul.f32 0.03125, %v564_v45 }
 0x372   : > { %v566_v47 = vadd.f32 1e-05, %v565_v46 }
 0x374   : > { %872 = vrsqrt.f32 %v566_v47 }
 0x37e   : > { %v873_v48 = vpop.eup %872 }
 0x37f   : > { %v568_v50 = vmul.f32 %v873_v48, %v558_v40 }
 0x381   : > { %v576_v52 = vmul.f32 %v719_v49, %v568_v50 }
 0x383   : > { %v584_v53 = vadd.f32 %v720_v51, %v576_v52 }
 0x385   : > { %585 = vst [vmem:[%s322_s19] sm:$0xff] %v584_v53 }
 0x386   : > { %973 = shalt.err (!%p970_p2)
}
 0x387   : > { %s974_s12 = scalar_lea.hbm %s1284_s9, 128  ;;  %s978_s21 = scalar_lea.hbm %s1335_s7, 256 }
 0x388   : > { %p975_p13 = scmp.ne.s32.totalorder %s1284_s9, %s974_s12  ;;  %p979_p4 = scmp.lt.u32.totalorder %s1284_s9, %s1335_s7 }
 0x389   : > { %p980_p5 = scmp.lt.u32.totalorder %s978_s21, %s974_s12  ;;  %p982_p11 = scmp.lt.u32.totalorder %s974_s12, %s1284_s9 }
 0x38a   : > { %p976_p6 = pnand %p975_p13, %p1349_p0 }
 0x38b   : > { %p981_p8 = por %p980_p5, %p979_p4 }
 0x38c   : > { %p977_p10 = pneg %p976_p6 }
 0x38d   : > { %p983_p1 = por %p982_p11, %p981_p8 }
 0x38f   : > { %p984_p3 = pnand %p983_p1, %p977_p10 }
 0x391   : > { %987 = shalt.err (!%p984_p3)
}
 0x392   : > { %793 = dma.vmem_to_hbm [thread:$0]  (%p1349_p0), %s1286_s23, 128, %s1284_s9, %s587_s20  }
 0x393 PF: > { %s612_s29 = sand.u32 1, %s1018_s24   ;;  %p1350_p7 = scmp.ne.s32.totalorder %s1340_s8, 0 }
 0x394   : > { %p1351_p9 = scmp.ge.s32.totalorder %s1030_s27, 2  ;;  %s613_s30 = scalar_lea.sflag [#allocation4], %s612_s29 }
 0x396   : > { %p807_p12 = pnand %p1351_p9, %p1350_p7 }
 0x398   : > { %1013 = dma.done.wait (!%p807_p12), %s613_s30, 128  }
 0x399   : > { %1015 = vsyncadd (!%p807_p12), %s613_s30, 4294967168  ;;  %p21_p2 = scmp.ge.s32.totalorder %s1190_s13, 4   ;;  %s1352_s24 = smov %s1022_s25 }
 0x39a   : > { %s1353_s25 = smov %s1026_s26  ;;  %s1354_s26 = smov %s1206_s17 }
 0x39b   : > { %s1355_s27 = smov %s1190_s13  ;;  %23 = sbr.rel (!%p21_p2) target bundleno = 6 (0x6), region = 101 }
 0x3a2   :  { %618 = vsyncpa [#allocation3], 1 }
 0x3a3   :  { %620 = vsyncpa [#allocation3 + $0x1], 1 }
 0x3a4   :  { %621 = vsyncpa [#allocation6], 1 }
 0x3a5   :  { %622 = vsyncpa [#allocation4], 1 }
 0x3a6   :  { %624 = vsyncpa [#allocation4 + $0x1], 1 }

</bundles_post_ra>
